<compile_context>
chip_gen: v7x
topology: tpu7x:2x2x1
jax: 0.10.0
libtpu: 0.0.40
codegen_flags: <defaults>
</compile_context>

<pallas_src>
import functools
import math

import jax
import jax.numpy as jnp
from jax.experimental import pallas as pl
from jax.experimental.pallas import tpu as pltpu


def _round_up(x, m):
    return ((x + m - 1) // m) * m


def _layernorm_kernel(x_ref, gamma_ref, beta_ref, o_ref, *, eps, d_model):
    # x_ref: (tile_rows, d_model) block in VMEM.
    x = x_ref[...].astype(jnp.float32)
    inv_d = 1.0 / float(d_model)
    # Single-pass biased mean/variance.
    s = jnp.sum(x, axis=-1, keepdims=True)
    sq = jnp.sum(x * x, axis=-1, keepdims=True)
    mean = s * inv_d
    var = jnp.maximum(sq * inv_d - mean * mean, 0.0)  # clamp fp cancellation
    inv = jax.lax.rsqrt(var + eps)
    normed = (x - mean) * inv
    # gamma/beta already f32, shape (1, d_model) -> broadcasts over rows.
    out = gamma_ref[...] * normed + beta_ref[...]
    o_ref[...] = out.astype(o_ref.dtype)


def layer_norm(x, gamma, beta, *, eps=1e-12, tile_rows=None,
               vmem_budget_bytes=32 << 20):
    """x: (..., d_model); gamma, beta: (d_model,)."""
    orig_shape = x.shape
    d_model = orig_shape[-1]
    rows = int(math.prod(orig_shape[:-1])) if len(orig_shape) > 1 else 1
    x2 = x.reshape(rows, d_model)

    # Hoisted f32 cast of the (tiny) scale/shift parameters.
    gamma2 = gamma.astype(jnp.float32).reshape(1, d_model)
    beta2 = beta.astype(jnp.float32).reshape(1, d_model)

    # --- Row tile: as large as the VMEM budget allows (sublane-aligned). ---
    itemsize = jnp.dtype(x.dtype).itemsize
    row_mult = {4: 8, 2: 16, 1: 32}.get(itemsize, 8)  # sublane packing per dtype
    if tile_rows is None:
        # Double-buffered input + output tiles (2x each) plus ~2 f32
        # intermediates per row inside the kernel.
        bytes_per_row = d_model * (4 * itemsize + 2 * 4)
        tile_rows = max(row_mult,
                        min(512, vmem_budget_bytes // max(1, bytes_per_row)))
    tile_rows = max(row_mult, (tile_rows // row_mult) * row_mult)
    tile_rows = min(tile_rows, _round_up(rows, row_mult))

    # --- Ragged rows: pad (at most one tile's worth) instead of asserting. ---
    rows_pad = _round_up(rows, tile_rows)
    if rows_pad != rows:
        x2 = jnp.pad(x2, ((0, rows_pad - rows), (0, 0)))

    grid = (rows_pad // tile_rows,)

    out = pl.pallas_call(
        functools.partial(_layernorm_kernel, eps=eps, d_model=d_model),
        out_shape=jax.ShapeDtypeStruct((rows_pad, d_model), x.dtype),
        grid_spec=pltpu.PrefetchScalarGridSpec(
            num_scalar_prefetch=0,
            grid=grid,
            in_specs=[
                pl.BlockSpec((tile_rows, d_model), lambda i: (i, 0)),
                pl.BlockSpec((1, d_model), lambda i: (0, 0)),
                pl.BlockSpec((1, d_model), lambda i: (0, 0)),
            ],
            out_specs=pl.BlockSpec((tile_rows, d_model), lambda i: (i, 0)),
        ),
        compiler_params=pltpu.CompilerParams(
            dimension_semantics=("parallel",),
            vmem_limit_bytes=64 << 20,
        ),
    )(x2, gamma2, beta2)

    if rows_pad != rows:
        out = out[:rows]
    return out.reshape(orig_shape)


if __name__ == "__main__":
    # Small shapes consistent with the module: batch=2, seq=8, d_model=32
    batch, seq, d_model = 2, 8, 32
    key = jax.random.PRNGKey(0)
    x = jax.random.normal(key, (batch, seq, d_model), dtype=jnp.float32)

    # nn.Parameter(torch.ones(d_model)) / torch.zeros(d_model)
    gamma = jnp.ones((d_model,), dtype=jnp.float32)
    beta = jnp.zeros((d_model,), dtype=jnp.float32)

    out = layer_norm(x, gamma, beta, eps=1e-12)
    out = jax.block_until_ready(out)

    # Reference in plain JAX (matches PyTorch: biased var, eps inside sqrt).
    mean = jnp.mean(x, axis=-1, keepdims=True)
    var = jnp.mean((x - mean) ** 2, axis=-1, keepdims=True)
    ref = gamma * ((x - mean) / jnp.sqrt(var + 1e-12)) + beta
    assert jnp.allclose(out, ref, atol=2e-5, rtol=2e-5), "mismatch vs reference"

    print("KERNEL_OK")
</pallas_src>

<mosaic_0001>
module attributes {stable_mosaic.version = 11 : i64} {
  func.func @_layernorm_kernel(%arg0: i32, %arg1: memref<16x32xf32, #tpu.memory_space<vmem>>, %arg2: memref<1x32xf32, #tpu.memory_space<vmem>>, %arg3: memref<1x32xf32, #tpu.memory_space<vmem>>, %arg4: memref<16x32xf32, #tpu.memory_space<vmem>>) attributes {dimension_semantics = [#tpu.dimension_semantics<parallel>], iteration_bounds = array<i64: 1>, scalar_prefetch = 0 : i64, scratch_operands = 0 : i64, tpu.core_type = #tpu.core_type<tc>, window_params = [{transform_indices = @transform_0, window_bounds = array<i64: 16, 32>}, {pipeline_mode = #tpu.pipeline_mode<synchronous>, transform_indices = @transform_1, window_bounds = array<i64: 1, 32>}, {pipeline_mode = #tpu.pipeline_mode<synchronous>, transform_indices = @transform_2, window_bounds = array<i64: 1, 32>}, {transform_indices = @transform_3, window_bounds = array<i64: 16, 32>}]} {
    %c0 = arith.constant 0 : index
    %c0_0 = arith.constant 0 : index
    %0 = vector.load %arg1[%c0, %c0_0] : memref<16x32xf32, #tpu.memory_space<vmem>>, vector<16x32xf32>
    %cst = arith.constant dense<0.000000e+00> : vector<16xf32>
    %1 = vector.multi_reduction <add>, %0, %cst [1] : vector<16x32xf32> to vector<16xf32>
    %2 = vector.shape_cast %1 : vector<16xf32> to vector<16x1xf32>
    %3 = arith.mulf %0, %0 : vector<16x32xf32>
    %cst_1 = arith.constant dense<0.000000e+00> : vector<16xf32>
    %4 = vector.multi_reduction <add>, %3, %cst_1 [1] : vector<16x32xf32> to vector<16xf32>
    %5 = vector.shape_cast %4 : vector<16xf32> to vector<16x1xf32>
    %cst_2 = arith.constant 3.125000e-02 : f32
    %6 = vector.broadcast %cst_2 : f32 to vector<16x1xf32>
    %7 = arith.mulf %2, %6 : vector<16x1xf32>
    %cst_3 = arith.constant 3.125000e-02 : f32
    %8 = vector.broadcast %cst_3 : f32 to vector<16x1xf32>
    %9 = arith.mulf %5, %8 : vector<16x1xf32>
    %10 = arith.mulf %7, %7 : vector<16x1xf32>
    %11 = arith.subf %9, %10 : vector<16x1xf32>
    %cst_4 = arith.constant 0.000000e+00 : f32
    %12 = vector.broadcast %cst_4 : f32 to vector<16x1xf32>
    %13 = arith.maximumf %11, %12 : vector<16x1xf32>
    %cst_5 = arith.constant 9.99999996E-13 : f32
    %14 = vector.broadcast %cst_5 : f32 to vector<16x1xf32>
    %15 = arith.addf %13, %14 : vector<16x1xf32>
    %16 = math.rsqrt %15 : vector<16x1xf32>
    %17 = vector.broadcast %7 : vector<16x1xf32> to vector<16x32xf32>
    %18 = arith.subf %0, %17 : vector<16x32xf32>
    %19 = vector.broadcast %16 : vector<16x1xf32> to vector<16x32xf32>
    %20 = arith.mulf %18, %19 : vector<16x32xf32>
    %c0_6 = arith.constant 0 : index
    %c0_7 = arith.constant 0 : index
    %21 = vector.load %arg2[%c0_6, %c0_7] : memref<1x32xf32, #tpu.memory_space<vmem>>, vector<1x32xf32>
    %22 = vector.broadcast %21 : vector<1x32xf32> to vector<16x32xf32>
    %23 = arith.mulf %22, %20 : vector<16x32xf32>
    %c0_8 = arith.constant 0 : index
    %c0_9 = arith.constant 0 : index
    %24 = vector.load %arg3[%c0_8, %c0_9] : memref<1x32xf32, #tpu.memory_space<vmem>>, vector<1x32xf32>
    %25 = vector.broadcast %24 : vector<1x32xf32> to vector<16x32xf32>
    %26 = arith.addf %23, %25 : vector<16x32xf32>
    %c0_10 = arith.constant 0 : index
    %c0_11 = arith.constant 0 : index
    %27 = vector.load %arg4[%c0_10, %c0_11] : memref<16x32xf32, #tpu.memory_space<vmem>>, vector<16x32xf32>
    tpu.vector_store %arg4[%c0_10, %c0_11], %26 {strides = array<i32>} : memref<16x32xf32, #tpu.memory_space<vmem>>, vector<16x32xf32>,
    return
  }
  func.func @transform_0(%arg0: i32) -> (i32, i32) {
    %c0_i32 = arith.constant 0 : i32
    %c0_i32_0 = arith.constant 0 : i32
    return %arg0, %c0_i32 : i32, i32
  }
  func.func @transform_1(%arg0: i32) -> (i32, i32) {
    %c0_i32 = arith.constant 0 : i32
    %c0_i32_0 = arith.constant 0 : i32
    %c0_i32_1 = arith.constant 0 : i32
    return %c0_i32, %c0_i32_0 : i32, i32
  }
  func.func @transform_2(%arg0: i32) -> (i32, i32) {
    %c0_i32 = arith.constant 0 : i32
    %c0_i32_0 = arith.constant 0 : i32
    %c0_i32_1 = arith.constant 0 : i32
    return %c0_i32, %c0_i32_0 : i32, i32
  }
  func.func @transform_3(%arg0: i32) -> (i32, i32) {
    %c0_i32 = arith.constant 0 : i32
    %c0_i32_0 = arith.constant 0 : i32
    return %arg0, %c0_i32 : i32, i32
  }
}

</mosaic_0001>

<bundles_post_ra>
// kernel: tpu_custom_call.1
= control target key start
LH: loop header
LB: loop body
LE: loop exit
PB: predicated region body
PF: predicated region fallthrough
CT: control target
= control target key end

     0   :  { %8 = vsyncpa [#allocation3], 0  ;;  %s324_s0 = inlined_call_operand.hbm [shape: f32[16,32], index: 0, kind: input, shape index: {}]   ;;  %s325_s1 = inlined_call_operand.hbm [shape: f32[1,32], index: 1, kind: input, shape index: {}]   ;;  %s326_s2 = inlined_call_operand.hbm [shape: f32[1,32], index: 2, kind: input, shape index: {}]   ;;  %s327_s3 = inlined_call_operand.hbm [shape: f32[16,32], index: 3, kind: output, shape index: {}]  }
   0x1   :  { %9 = vsyncpa [#allocation6], 0 }
   0x2   :  { %10 = vsyncpa [#allocation4], 0  ;;  %s231_s12 = smov [#allocation5]   ;;  %s232_s14 = smov [#allocation2]  }
   0x3   :  { %s29_s13 = sshll.u32 %s231_s12, 4  ;;  %s16_s15 = sshll.u32 %s232_s14, 4  ;;  %s30_s13 = int_to_ptr.vmem [resolvable:$true] %s29_s13  ;;  %s257_s15 = int_to_ptr.vmem [resolvable:$true] %s16_s15 }
   0x4   :  { %s137_s18 = scalar_lea.hbm %s325_s1, 16 }
   0x5   :  { %p138_p0 = scmp.ne.s32.totalorder %s325_s1, %s137_s18  ;;  %p141_p1 = scmp.lt.u32.totalorder %s137_s18, %s325_s1 }
   0x7   :  { %p143_p2 = pnand %p141_p1, %p138_p0 }
   0x9   :  { %146 = shalt.err (!%p143_p2)
}
   0xa   :  { %s147_s23 = scalar_lea.vmem %s30_s13, 16  ;;  %s151_s24 = scalar_lea.vmem %s30_s13, 32 }
   0xb   :  { %p148_p3 = scmp.ne.s32.totalorder %s30_s13, %s147_s23  ;;  %p152_p4 = scmp.lt.s32.totalorder %s30_s13, %s30_s13 }
   0xc   :  { %p153_p5 = scmp.lt.s32.totalorder %s151_s24, %s147_s23 }
   0xe   :  { %p154_p6 = por %p153_p5, %p152_p4 }
  0x10   :  { %p155_p7 = pnand %p154_p6, %p148_p3 }
  0x12   :  { %158 = shalt.err (!%p155_p7)
}
  0x13   :  { %32 = dma.hbm_to_vmem [thread:$0]  %s325_s1, 16, %s30_s13, [#allocation6]  }
  0x14   :  { %s159_s29 = scalar_lea.hbm %s324_s0, 256 }
  0x15   :  { %p160_p8 = scmp.ne.s32.totalorder %s324_s0, %s159_s29  ;;  %p163_p9 = scmp.lt.u32.totalorder %s159_s29, %s324_s0 }
  0x17   :  { %p165_p10 = pnand %p163_p9, %p160_p8 }
  0x19   :  { %168 = shalt.err (!%p165_p10)
}
  0x1a   :  { %s169_s7 = scalar_lea.vmem %s257_s15, 256  ;;  %p174_p12 = scmp.lt.s32.totalorder %s257_s15, %s257_s15 }
  0x1b   :  { %p170_p11 = scmp.ne.s32.totalorder %s257_s15, %s169_s7  ;;  %p175_p13 = scmp.lt.s32.totalorder %s169_s7, %s169_s7 }
  0x1d   :  { %p176_p0 = por %p175_p13, %p174_p12 }
  0x1f   :  { %p177_p1 = pnand %p176_p0, %p170_p11 }
  0x21   :  { %180 = shalt.err (!%p177_p1)
}
  0x22   :  { %s233_s1 = smov 128   ;;  %s234_s8 = smov 8  }
  0x23   :  { %22 = dma.hbm_to_vmem [thread:$0]  %s324_s0, 256, %s257_s15, [#allocation3], %s233_s1, %s233_s1, %s234_s8  }
  0x24   :  { %s235_s11 = smov [#allocation7]   ;;  %s181_s16 = scalar_lea.hbm %s326_s2, 16 }
  0x25   :  { %s39_s12 = sshll.u32 %s235_s11, 4  ;;  %p182_p2 = scmp.ne.s32.totalorder %s326_s2, %s181_s16  ;;  %s40_s12 = int_to_ptr.vmem [resolvable:$true] %s39_s12 }
  0x26   :  { %p185_p3 = scmp.lt.u32.totalorder %s181_s16, %s326_s2 }
  0x28   :  { %p187_p4 = pnand %p185_p3, %p182_p2 }
  0x2a   :  { %190 = shalt.err (!%p187_p4)
}
  0x2b   :  { %s191_s21 = scalar_lea.vmem %s40_s12, 16  ;;  %s195_s0 = scalar_lea.vmem %s40_s12, 32 }
  0x2c   :  { %p192_p5 = scmp.ne.s32.totalorder %s40_s12, %s191_s21  ;;  %p196_p6 = scmp.lt.s32.totalorder %s40_s12, %s40_s12 }
  0x2d   :  { %p197_p7 = scmp.lt.s32.totalorder %s195_s0, %s191_s21 }
  0x2f   :  { %p198_p8 = por %p197_p7, %p196_p6 }
  0x31   :  { %p199_p9 = pnand %p198_p8, %p192_p5 }
  0x33   :  { %202 = shalt.err (!%p199_p9)
}
  0x34   :  { %42 = dma.hbm_to_vmem [thread:$0]  %s326_s2, 16, %s40_s12, [#allocation6]  }
  0x35   :  { %225 = dma.done.wait [#allocation3], 256  }
  0x36   :  { %226 = vsyncadd [#allocation3], 4294967040 }
  0x37   :  { %227 = dma.done.wait [#allocation6], 32  }
  0x38   :  { %228 = vsyncadd [#allocation6], 4294967264  ;;  %vm54_vm0 = vcmask 261120   ;;  %v52_v0 = vld [vmem:[#allocation2] sm:$0xff]  ;;  %v53_v1 = vld [vmem:[#allocation2 + $0x8] sm:$0xff]  ;;  %s236_s2 = smov [#allocation8]  }
  0x39   :  { %v55_v2 = vsel %vm54_vm0, %v52_v0, 0.0  ;;  %v61_v3 = vmul.f32 %v52_v0, %v52_v0  ;;  %v62_v4 = vmul.f32 %v53_v1, %v53_v1  ;;  %v58_v6 = vsel %vm54_vm0, %v53_v1, 0.0  ;;  %v125_v26 = vld [vmem:[#allocation5] ss:$0 sm:$0xff]  ;;  %v126_v28 = vld [vmem:[#allocation7] ss:$0 sm:$0xff] }
  0x3a   :  { %56 = vadd.xlane.f32.xlu0 %v55_v2  ;;  %s112_s23 = sshll.u32 %s236_s2, 4  ;;  %s113_s23 = int_to_ptr.vmem [resolvable:$true] %s112_s23 }
  0x3b   :  { %v63_v5 = vsel %vm54_vm0, %v61_v3, 0.0  ;;  %v66_v7 = vsel %vm54_vm0, %v62_v4, 0.0  ;;  %s203_s24 = scalar_lea.vmem %s113_s23, 256  ;;  %p208_p11 = scmp.lt.s32.totalorder %s113_s23, %s113_s23 }
  0x3c   :  { %64 = vadd.xlane.f32.xlu1 %v63_v5  ;;  %p204_p10 = scmp.ne.s32.totalorder %s113_s23, %s203_s24  ;;  %p209_p12 = scmp.lt.s32.totalorder %s203_s24, %s203_s24 }
  0x3e   :  { %59 = vadd.xlane.f32.xlu0 %v58_v6  ;;  %p210_p13 = por %p209_p12, %p208_p11 }
  0x40   :  { %67 = vadd.xlane.f32.xlu1 %v66_v7  ;;  %p211_p0 = pnand %p210_p13, %p204_p10 }
  0xc7   :  { %v57_v8 = vpop.xlane.xlu0 %56 }
  0xc8   :  { %v69_v9 = vmul.f32 0.03125, %v57_v8 }
  0xc9   :  { %v65_v10 = vpop.xlane.xlu1 %64 }
  0xca   :  { %v73_v11 = vmul.f32 %v69_v9, %v69_v9  ;;  %v71_v12 = vmul.f32 0.03125, %v65_v10  ;;  %v83_v24 = vsub.f32 %v52_v0, %v69_v9 }
  0xcb   :  { %v60_v13 = vpop.xlane.xlu0 %59 }
  0xcc   :  { %v75_v14 = vsub.f32 %v71_v12, %v73_v11  ;;  %v70_v15 = vmul.f32 0.03125, %v60_v13 }
  0xcd   :  { %v68_v16 = vpop.xlane.xlu1 %67 }
  0xce   :  { %v77_v17 = vmax.f32 %v75_v14, 0.0  ;;  %v74_v18 = vmul.f32 %v70_v15, %v70_v15  ;;  %v72_v19 = vmul.f32 0.03125, %v68_v16  ;;  %v84_v29 = vsub.f32 %v53_v1, %v70_v15 }
  0xd0   :  { %v79_v20 = vadd.f32 1e-12, %v77_v17  ;;  %v76_v21 = vsub.f32 %v72_v19, %v74_v18 }
  0xd2   :  { %133 = vrsqrt.f32 %v79_v20  ;;  %v78_v22 = vmax.f32 %v76_v21, 0.0 }
  0xd4   :  { %v80_v23 = vadd.f32 1e-12, %v78_v22 }
  0xd6   :  { %135 = vrsqrt.f32 %v80_v23 }
  0xdc   :  { %v134_v25 = vpop.eup %133 }
  0xdd   :  { %v85_v27 = vmul.f32 %v134_v25, %v83_v24 }
  0xdf   :  { %v94_v30 = vmul.f32 %v125_v26, %v85_v27 }
  0xe0   :  { %v136_v31 = vpop.eup %135 }
  0xe1   :  { %v86_v32 = vmul.f32 %v136_v31, %v84_v29  ;;  %v103_v33 = vadd.f32 %v126_v28, %v94_v30 }
  0xe3   :  { %v95_v34 = vmul.f32 %v125_v26, %v86_v32  ;;  %105 = vst.msk [vmem:[#allocation8] sm:$0xff] %vm54_vm0, %v103_v33 }
  0xe5   :  { %v104_v35 = vadd.f32 %v126_v28, %v95_v34 }
  0xe7   :  { %106 = vst.msk [vmem:[#allocation8 + $0x8] sm:$0xff] %vm54_vm0, %v104_v35 }
  0xe8   :  { %214 = shalt.err (!%p211_p0)
}
  0xe9   :  { %s215_s27 = scalar_lea.hbm %s327_s3, 256 }
  0xea   :  { %p216_p1 = scmp.ne.s32.totalorder %s327_s3, %s215_s27  ;;  %p219_p2 = scmp.lt.u32.totalorder %s215_s27, %s327_s3 }
  0xec   :  { %p221_p3 = pnand %p219_p2, %p216_p1 }
  0xee   :  { %224 = shalt.err (!%p221_p3)
}
  0xef   :  { %118 = dma.vmem_to_hbm [thread:$0]  %s113_s23, 256, %s327_s3, [#allocation4], %s233_s1, %s233_s1, %s234_s8  }
  0xf0   :  { %229 = dma.done.wait [#allocation4], 256  }
  0xf1   :  { %230 = vsyncadd [#allocation4], 4294967040 }
  0xf2   :  { %122 = vsyncpa [#allocation3], 1 }
  0xf3   :  { %123 = vsyncpa [#allocation6], 1 }
  0xf4   :  { %124 = vsyncpa [#allocation4], 1 }

</bundles_post_ra>
